<compile_context>
chip_gen: v5e
topology: v5e:2x2
jax: 0.10.0
libtpu: 0.0.40
codegen_flags: <defaults>
</compile_context>

<pallas_src>
import functools

import jax
import jax.numpy as jnp
from jax.experimental import pallas as pl
from jax.experimental.pallas import tpu as pltpu


# ---------------------------------------------------------------------------
# Kernels
# ---------------------------------------------------------------------------

def _outconv_kernel_vpu(x_ref, w_ref, b_ref, o_ref):
    """Small-channel path: scalar weights (SMEM) x spatial vregs on the VPU.

    x_ref: (BN, Cin, T) VMEM      w_ref: (Cout, Cin) SMEM f32
    b_ref: (Cout,)      SMEM f32  o_ref: (BN, Cout, T) VMEM
    """
    bn, cin, T = x_ref.shape
    cout = o_ref.shape[1]

    # Hoist the (tiny) scalar weights / bias out of all loops: one sld each.
    w = [[w_ref[co, ci] for ci in range(cin)] for co in range(cout)]
    b = [b_ref[co] for co in range(cout)]

    # Lane-chunked accumulation: keep the live accumulator + one input row to a
    # handful of vregs per output channel, independent of the DMA tile size T.
    max_chunk = max(128, min(2048, ((4096 // max(cout, 1)) // 128) * 128))
    chunk = min(T, max_chunk)
    if T >= 128:
        chunk = max(128, (chunk // 128) * 128)
    n_full = T // chunk
    rem = T - n_full * chunk

    def process(bi, off, width):
        rows = []
        for co in range(cout):
            # Per-row ref loads (cast per row) -- no whole-tile upcast copy.
            acc = (x_ref[bi, pl.ds(0, 1), pl.ds(off, width)].astype(jnp.float32)
                   * w[co][0] + b[co])
            for ci in range(1, cin):
                acc = acc + w[co][ci] * x_ref[
                    bi, pl.ds(ci, 1), pl.ds(off, width)].astype(jnp.float32)
            rows.append(acc)
        # One (Cout, width) store instead of Cout masked sublane-row stores.
        tile = rows[0] if cout == 1 else jnp.concatenate(rows, axis=0)
        o_ref[bi, :, pl.ds(off, width)] = tile.astype(o_ref.dtype)

    @pl.loop(0, bn)
    def _(bi):
        if n_full == 1 and rem == 0:
            process(bi, 0, chunk)                      # static offset fast path
        else:
            if n_full > 0:
                @pl.loop(0, n_full)
                def _(s):
                    off = s * chunk
                    if chunk % 128 == 0:
                        off = pl.multiple_of(off, 128)
                    process(bi, off, chunk)
            if rem > 0:
                process(bi, n_full * chunk, rem)       # static tail


def _outconv_kernel_mxu(x_ref, w_ref, b_ref, o_ref):
    """Wide-channel path: (Cout, Cin) @ (Cin, T) on the MXU, f32 accumulate.

    x_ref: (BN, Cin, T) VMEM   w_ref: (Cout, Cin) VMEM (activation dtype)
    b_ref: (Cout, 1) VMEM f32  o_ref: (BN, Cout, T) VMEM
    """
    bn = x_ref.shape[0]
    w = w_ref[...]            # pre-cast in the wrapper; no per-step astype
    bias = b_ref[...]         # already f32

    @pl.loop(0, bn)
    def _(bi):
        acc = jnp.dot(w, x_ref[bi],
                      preferred_element_type=jnp.float32,
                      precision=jax.lax.Precision.HIGHEST)
        o_ref[bi] = (acc + bias).astype(o_ref.dtype)


# ---------------------------------------------------------------------------
# Tile planning (generation-aware)
# ---------------------------------------------------------------------------

def _hw_params():
    """VMEM capacity + per-step byte target, by TPU generation."""
    try:
        vmem_cap = int(pltpu.get_tpu_info().vmem_capacity_bytes)
    except Exception:
        vmem_cap = 64 * 1024 * 1024            # safe for every generation (v7x)
    try:
        kind = jax.devices()[0].device_kind.lower()
    except Exception:
        kind = ""
    if "v5" in kind:
        step_target = 1 * 1024 * 1024          # ~0.35us * 0.82 TB/s ~ 290 KiB
    elif "7" in kind:
        step_target = 4 * 1024 * 1024          # ~0.35us * 3.2 TB/s ~ 1.1 MiB
    else:
        step_target = 2 * 1024 * 1024          # v6e: ~0.35us * 1.4 TB/s ~ 450 KiB
    return vmem_cap, step_target


def _plan_tiles(N, HW, cin, cout, dtype_bytes, max_tile_hw=None):
    """Pick (BN, tile_hw) so each grid step moves ~step_target bytes, fits VMEM,
    and the grid still has enough steps to feed both v7x TensorCores."""
    vmem_cap, step_target = _hw_params()
    per_col = (cin + cout) * dtype_bytes                 # in+out bytes / column

    vmem_budget = max(8 * 1024 * 1024, vmem_cap // 3)    # double-buffered blocks
    max_cols_vmem = max(128, vmem_budget // (2 * per_col))
    target_cols = max(128, step_target // per_col)
    cols_cap = min(max_cols_vmem, target_cols, 65536)
    if max_tile_hw is not None:
        cols_cap = min(cols_cap, int(max_tile_hw))

    # Spatial tile: full row if it fits the per-step column budget.
    if HW <= cols_cap:
        tile_hw = HW
    else:
        tile_hw = max(128, (cols_cap // 128) * 128)

    # Fold batch when one full spatial row is still too small a DMA.
    bn = 1
    if tile_hw == HW:
        want = min(N, max(1, cols_cap // max(HW, 1)))
        while want > 1 and N % want != 0:                # keep BN | N (no ragged)
            want -= 1
        bn = want

    # Keep enough grid steps for megacore (2 TCs on v7x), preferring to shrink
    # the batch fold first, then the spatial tile (but not below ~step_target/4).
    min_steps = 4

    def steps(bn_, thw_):
        return ((N + bn_ - 1) // bn_) * ((HW + thw_ - 1) // thw_)

    while steps(bn, tile_hw) < min_steps and bn > 1:
        nb = bn // 2
        while nb > 1 and N % nb != 0:
            nb -= 1
        nb = max(1, nb)
        if nb == bn:
            break
        bn = nb
    while (steps(bn, tile_hw) < min_steps and tile_hw > 256
           and (tile_hw // 2) * per_col * bn >= step_target // 4):
        new = max(128, ((tile_hw // 2) // 128) * 128)
        if new >= tile_hw:
            break
        tile_hw = new

    return bn, tile_hw, vmem_cap


# ---------------------------------------------------------------------------
# Forward wrapper
# ---------------------------------------------------------------------------

@functools.partial(jax.jit, static_argnames=("max_tile_hw",))
def outconv_forward(x_nchw, weight, bias, *, max_tile_hw=None):
    """1x1 Conv2d forward matching nn.Conv2d(in_channels, out_channels, 1).

    x_nchw: (N, Cin, H, W)
    weight: (Cout, Cin, 1, 1)   (PyTorch conv weight layout)
    bias:   (Cout,)
    returns (N, Cout, H, W)
    """
    N, Cin, H, W = x_nchw.shape
    Cout = weight.shape[0]
    HW = H * W

    x3 = x_nchw.reshape(N, Cin, HW)        # free reshape; data stays NCHW
    w2 = weight.reshape(Cout, Cin)
    dtype_bytes = jnp.dtype(x_nchw.dtype).itemsize

    bn, tile_hw, vmem_cap = _plan_tiles(N, HW, Cin, Cout, dtype_bytes, max_tile_hw)
    grid = (pl.cdiv(N, bn), pl.cdiv(HW, tile_hw))

    x_spec = pl.BlockSpec((bn, Cin, tile_hw), lambda nb, t: (nb, 0, t))
    o_spec = pl.BlockSpec((bn, Cout, tile_hw), lambda nb, t: (nb, 0, t))

    use_vpu = (Cout <= 8) and (Cin <= 16)
    if use_vpu:
        # Tiny channel counts: weights/bias as f32 scalars in SMEM.
        kernel = _outconv_kernel_vpu
        w_arg = w2.astype(jnp.float32)
        b_arg = bias.astype(jnp.float32)
        w_spec = pl.BlockSpec(memory_space=pltpu.MemorySpace.SMEM)
        b_spec = pl.BlockSpec(memory_space=pltpu.MemorySpace.SMEM)
    else:
        # NOTE: for bf16 activations the weight is downcast to bf16 here (slight
        # divergence from PyTorch mixed-precision conv which keeps f32 weights).
        kernel = _outconv_kernel_mxu
        w_arg = w2.astype(x_nchw.dtype)                 # cast once, not per step
        b_arg = bias.reshape(Cout, 1).astype(jnp.float32)
        w_spec = pl.BlockSpec((Cout, Cin), lambda nb, t: (0, 0))
        b_spec = pl.BlockSpec((Cout, 1), lambda nb, t: (0, 0))

    # Explicit VMEM limit sized for the chosen (double-buffered) blocks plus the
    # f32 MXU intermediate, capped well below the physical capacity.
    block_bytes = bn * (Cin + Cout) * tile_hw * dtype_bytes
    scratch_f32 = 0 if use_vpu else bn * Cout * tile_hw * 4
    vmem_limit = int(min(vmem_cap * 3 // 4,
                         max(32 * 1024 * 1024,
                             2 * block_bytes + 2 * scratch_f32 + (8 << 20))))

    out = pl.pallas_call(
        kernel,
        out_shape=jax.ShapeDtypeStruct((N, Cout, HW), x_nchw.dtype),
        grid_spec=pltpu.PrefetchScalarGridSpec(
            num_scalar_prefetch=0,
            grid=grid,
            in_specs=[x_spec, w_spec, b_spec],
            out_specs=o_spec,
        ),
        compiler_params=pltpu.CompilerParams(
            dimension_semantics=("parallel", "parallel"),
            vmem_limit_bytes=vmem_limit),
    )(x3, w_arg, b_arg)

    return out.reshape(N, Cout, H, W)


def init_outconv_params(key, in_channels, out_channels, dtype=jnp.float32):
    """Deterministic init mirroring nn.Conv2d default (kaiming-uniform-ish)."""
    kw, kb = jax.random.split(key)
    fan_in = in_channels  # 1x1 kernel
    bound = 1.0 / (fan_in ** 0.5)
    weight = jax.random.uniform(
        kw, (out_channels, in_channels, 1, 1), dtype, minval=-bound, maxval=bound)
    bias = jax.random.uniform(
        kb, (out_channels,), dtype, minval=-bound, maxval=bound)
    return weight, bias


if __name__ == "__main__":
    key = jax.random.PRNGKey(0)
    keys = jax.random.split(key, 6)
    HI = jax.lax.Precision.HIGHEST

    # Case 1: typical segmentation-head shape -> VPU/SMEM path, lane-dense tile.
    N, Cin, H, W, Cout = 2, 4, 16, 16, 3
    x = jax.random.normal(keys[0], (N, Cin, H, W), jnp.float32)
    weight, bias = init_outconv_params(keys[1], Cin, Cout)
    y = jax.block_until_ready(outconv_forward(x, weight, bias))
    y_ref = (jnp.einsum("nchw,oc->nohw", x, weight.reshape(Cout, Cin), precision=HI)
             + bias[None, :, None, None])
    assert y.shape == (N, Cout, H, W)
    assert jnp.allclose(y, y_ref, atol=1e-4, rtol=1e-4), "VPU path mismatch"

    # Case 2: wider channels -> MXU path; max_tile_hw=128 forces several lane tiles.
    Cin2, Cout2 = 32, 32
    x2 = jax.random.normal(keys[2], (N, Cin2, H, W), jnp.float32)
    w2, b2 = init_outconv_params(keys[3], Cin2, Cout2)
    y2 = jax.block_until_ready(outconv_forward(x2, w2, b2, max_tile_hw=128))
    y2_ref = (jnp.einsum("nchw,oc->nohw", x2, w2.reshape(Cout2, Cin2), precision=HI)
              + b2[None, :, None, None])
    assert y2.shape == (N, Cout2, H, W)
    assert jnp.allclose(y2, y2_ref, atol=1e-4, rtol=1e-4), "MXU path mismatch"

    # Case 3: many small images -> batch folded into the block (BN > 1).
    N3, Cin3, Cout3, H3, W3 = 16, 4, 2, 8, 8
    x3 = jax.random.normal(keys[4], (N3, Cin3, H3, W3), jnp.float32)
    w3, b3 = init_outconv_params(keys[5], Cin3, Cout3)
    y3 = jax.block_until_ready(outconv_forward(x3, w3, b3))
    y3_ref = (jnp.einsum("nchw,oc->nohw", x3, w3.reshape(Cout3, Cin3), precision=HI)
              + b3[None, :, None, None])
    assert y3.shape == (N3, Cout3, H3, W3)
    assert jnp.allclose(y3, y3_ref, atol=1e-4, rtol=1e-4), "batch-fold path mismatch"

    print("KERNEL_OK")
</pallas_src>

<mosaic_0001>
module attributes {stable_mosaic.version = 11 : i64} {
  func.func @_outconv_kernel_vpu(%arg0: i32, %arg1: i32, %arg2: memref<1x4x256xf32, #tpu.memory_space<vmem>>, %arg3: memref<3x4xf32, #tpu.memory_space<smem>>, %arg4: memref<3xf32, #tpu.memory_space<smem>>, %arg5: memref<1x3x256xf32, #tpu.memory_space<vmem>>) attributes {dimension_semantics = [#tpu.dimension_semantics<parallel>, #tpu.dimension_semantics<parallel>], iteration_bounds = array<i64: 2, 1>, scalar_prefetch = 0 : i64, scratch_operands = 0 : i64, tpu.core_type = #tpu.core_type<tc>, window_params = [{transform_indices = @transform_0, window_bounds = array<i64: 1, 4, 256>}, {transform_indices = @transform_1, window_bounds = array<i64: 3, 4>}, {transform_indices = @transform_2, window_bounds = array<i64: 3>}, {transform_indices = @transform_3, window_bounds = array<i64: 1, 3, 256>}]} {
    %c0 = arith.constant 0 : index
    %c0_0 = arith.constant 0 : index
    %0 = memref.load %arg3[%c0, %c0_0] : memref<3x4xf32, #tpu.memory_space<smem>>
    %c0_1 = arith.constant 0 : index
    %c1 = arith.constant 1 : index
    %1 = memref.load %arg3[%c0_1, %c1] : memref<3x4xf32, #tpu.memory_space<smem>>
    %c0_2 = arith.constant 0 : index
    %c2 = arith.constant 2 : index
    %2 = memref.load %arg3[%c0_2, %c2] : memref<3x4xf32, #tpu.memory_space<smem>>
    %c0_3 = arith.constant 0 : index
    %c3 = arith.constant 3 : index
    %3 = memref.load %arg3[%c0_3, %c3] : memref<3x4xf32, #tpu.memory_space<smem>>
    %c1_4 = arith.constant 1 : index
    %c0_5 = arith.constant 0 : index
    %4 = memref.load %arg3[%c1_4, %c0_5] : memref<3x4xf32, #tpu.memory_space<smem>>
    %c1_6 = arith.constant 1 : index
    %c1_7 = arith.constant 1 : index
    %5 = memref.load %arg3[%c1_6, %c1_7] : memref<3x4xf32, #tpu.memory_space<smem>>
    %c1_8 = arith.constant 1 : index
    %c2_9 = arith.constant 2 : index
    %6 = memref.load %arg3[%c1_8, %c2_9] : memref<3x4xf32, #tpu.memory_space<smem>>
    %c1_10 = arith.constant 1 : index
    %c3_11 = arith.constant 3 : index
    %7 = memref.load %arg3[%c1_10, %c3_11] : memref<3x4xf32, #tpu.memory_space<smem>>
    %c2_12 = arith.constant 2 : index
    %c0_13 = arith.constant 0 : index
    %8 = memref.load %arg3[%c2_12, %c0_13] : memref<3x4xf32, #tpu.memory_space<smem>>
    %c2_14 = arith.constant 2 : index
    %c1_15 = arith.constant 1 : index
    %9 = memref.load %arg3[%c2_14, %c1_15] : memref<3x4xf32, #tpu.memory_space<smem>>
    %c2_16 = arith.constant 2 : index
    %c2_17 = arith.constant 2 : index
    %10 = memref.load %arg3[%c2_16, %c2_17] : memref<3x4xf32, #tpu.memory_space<smem>>
    %c2_18 = arith.constant 2 : index
    %c3_19 = arith.constant 3 : index
    %11 = memref.load %arg3[%c2_18, %c3_19] : memref<3x4xf32, #tpu.memory_space<smem>>
    %c0_20 = arith.constant 0 : index
    %12 = memref.load %arg4[%c0_20] : memref<3xf32, #tpu.memory_space<smem>>
    %c1_21 = arith.constant 1 : index
    %13 = memref.load %arg4[%c1_21] : memref<3xf32, #tpu.memory_space<smem>>
    %c2_22 = arith.constant 2 : index
    %14 = memref.load %arg4[%c2_22] : memref<3xf32, #tpu.memory_space<smem>>
    %c0_i32 = arith.constant 0 : i32
    %c1_i32 = arith.constant 1 : i32
    %15 = arith.muli %c0_i32, %c1_i32 : i32
    %c0_i32_23 = arith.constant 0 : i32
    %16 = arith.addi %c0_i32_23, %15 : i32
    %17 = arith.index_cast %16 : i32 to index
    %c0_24 = arith.constant 0 : index
    %c0_25 = arith.constant 0 : index
    %18 = vector.load %arg2[%17, %c0_24, %c0_25] : memref<1x4x256xf32, #tpu.memory_space<vmem>>, vector<1x1x256xf32>
    %19 = vector.shape_cast %18 : vector<1x1x256xf32> to vector<1x256xf32>
    %20 = vector.broadcast %0 : f32 to vector<1x256xf32>
    %21 = arith.mulf %19, %20 : vector<1x256xf32>
    %22 = vector.broadcast %12 : f32 to vector<1x256xf32>
    %23 = arith.addf %21, %22 : vector<1x256xf32>
    %24 = arith.index_cast %16 : i32 to index
    %c1_26 = arith.constant 1 : index
    %c0_27 = arith.constant 0 : index
    %25 = vector.load %arg2[%24, %c1_26, %c0_27] : memref<1x4x256xf32, #tpu.memory_space<vmem>>, vector<1x1x256xf32>
    %26 = vector.shape_cast %25 : vector<1x1x256xf32> to vector<1x256xf32>
    %27 = vector.broadcast %1 : f32 to vector<1x256xf32>
    %28 = arith.mulf %27, %26 : vector<1x256xf32>
    %29 = arith.addf %23, %28 : vector<1x256xf32>
    %30 = arith.index_cast %16 : i32 to index
    %c2_28 = arith.constant 2 : index
    %c0_29 = arith.constant 0 : index
    %31 = vector.load %arg2[%30, %c2_28, %c0_29] : memref<1x4x256xf32, #tpu.memory_space<vmem>>, vector<1x1x256xf32>
    %32 = vector.shape_cast %31 : vector<1x1x256xf32> to vector<1x256xf32>
    %33 = vector.broadcast %2 : f32 to vector<1x256xf32>
    %34 = arith.mulf %33, %32 : vector<1x256xf32>
    %35 = arith.addf %29, %34 : vector<1x256xf32>
    %36 = arith.index_cast %16 : i32 to index
    %c3_30 = arith.constant 3 : index
    %c0_31 = arith.constant 0 : index
    %37 = vector.load %arg2[%36, %c3_30, %c0_31] : memref<1x4x256xf32, #tpu.memory_space<vmem>>, vector<1x1x256xf32>
    %38 = vector.shape_cast %37 : vector<1x1x256xf32> to vector<1x256xf32>
    %39 = vector.broadcast %3 : f32 to vector<1x256xf32>
    %40 = arith.mulf %39, %38 : vector<1x256xf32>
    %41 = arith.addf %35, %40 : vector<1x256xf32>
    %42 = arith.index_cast %16 : i32 to index
    %c0_32 = arith.constant 0 : index
    %c0_33 = arith.constant 0 : index
    %43 = vector.load %arg2[%42, %c0_32, %c0_33] : memref<1x4x256xf32, #tpu.memory_space<vmem>>, vector<1x1x256xf32>
    %44 = vector.shape_cast %43 : vector<1x1x256xf32> to vector<1x256xf32>
    %45 = vector.broadcast %4 : f32 to vector<1x256xf32>
    %46 = arith.mulf %44, %45 : vector<1x256xf32>
    %47 = vector.broadcast %13 : f32 to vector<1x256xf32>
    %48 = arith.addf %46, %47 : vector<1x256xf32>
    %49 = arith.index_cast %16 : i32 to index
    %c1_34 = arith.constant 1 : index
    %c0_35 = arith.constant 0 : index
    %50 = vector.load %arg2[%49, %c1_34, %c0_35] : memref<1x4x256xf32, #tpu.memory_space<vmem>>, vector<1x1x256xf32>
    %51 = vector.shape_cast %50 : vector<1x1x256xf32> to vector<1x256xf32>
    %52 = vector.broadcast %5 : f32 to vector<1x256xf32>
    %53 = arith.mulf %52, %51 : vector<1x256xf32>
    %54 = arith.addf %48, %53 : vector<1x256xf32>
    %55 = arith.index_cast %16 : i32 to index
    %c2_36 = arith.constant 2 : index
    %c0_37 = arith.constant 0 : index
    %56 = vector.load %arg2[%55, %c2_36, %c0_37] : memref<1x4x256xf32, #tpu.memory_space<vmem>>, vector<1x1x256xf32>
    %57 = vector.shape_cast %56 : vector<1x1x256xf32> to vector<1x256xf32>
    %58 = vector.broadcast %6 : f32 to vector<1x256xf32>
    %59 = arith.mulf %58, %57 : vector<1x256xf32>
    %60 = arith.addf %54, %59 : vector<1x256xf32>
    %61 = arith.index_cast %16 : i32 to index
    %c3_38 = arith.constant 3 : index
    %c0_39 = arith.constant 0 : index
    %62 = vector.load %arg2[%61, %c3_38, %c0_39] : memref<1x4x256xf32, #tpu.memory_space<vmem>>, vector<1x1x256xf32>
    %63 = vector.shape_cast %62 : vector<1x1x256xf32> to vector<1x256xf32>
    %64 = vector.broadcast %7 : f32 to vector<1x256xf32>
    %65 = arith.mulf %64, %63 : vector<1x256xf32>
    %66 = arith.addf %60, %65 : vector<1x256xf32>
    %67 = arith.index_cast %16 : i32 to index
    %c0_40 = arith.constant 0 : index
    %c0_41 = arith.constant 0 : index
    %68 = vector.load %arg2[%67, %c0_40, %c0_41] : memref<1x4x256xf32, #tpu.memory_space<vmem>>, vector<1x1x256xf32>
    %69 = vector.shape_cast %68 : vector<1x1x256xf32> to vector<1x256xf32>
    %70 = vector.broadcast %8 : f32 to vector<1x256xf32>
    %71 = arith.mulf %69, %70 : vector<1x256xf32>
    %72 = vector.broadcast %14 : f32 to vector<1x256xf32>
    %73 = arith.addf %71, %72 : vector<1x256xf32>
    %74 = arith.index_cast %16 : i32 to index
    %c1_42 = arith.constant 1 : index
    %c0_43 = arith.constant 0 : index
    %75 = vector.load %arg2[%74, %c1_42, %c0_43] : memref<1x4x256xf32, #tpu.memory_space<vmem>>, vector<1x1x256xf32>
    %76 = vector.shape_cast %75 : vector<1x1x256xf32> to vector<1x256xf32>
    %77 = vector.broadcast %9 : f32 to vector<1x256xf32>
    %78 = arith.mulf %77, %76 : vector<1x256xf32>
    %79 = arith.addf %73, %78 : vector<1x256xf32>
    %80 = arith.index_cast %16 : i32 to index
    %c2_44 = arith.constant 2 : index
    %c0_45 = arith.constant 0 : index
    %81 = vector.load %arg2[%80, %c2_44, %c0_45] : memref<1x4x256xf32, #tpu.memory_space<vmem>>, vector<1x1x256xf32>
    %82 = vector.shape_cast %81 : vector<1x1x256xf32> to vector<1x256xf32>
    %83 = vector.broadcast %10 : f32 to vector<1x256xf32>
    %84 = arith.mulf %83, %82 : vector<1x256xf32>
    %85 = arith.addf %79, %84 : vector<1x256xf32>
    %86 = arith.index_cast %16 : i32 to index
    %c3_46 = arith.constant 3 : index
    %c0_47 = arith.constant 0 : index
    %87 = vector.load %arg2[%86, %c3_46, %c0_47] : memref<1x4x256xf32, #tpu.memory_space<vmem>>, vector<1x1x256xf32>
    %88 = vector.shape_cast %87 : vector<1x1x256xf32> to vector<1x256xf32>
    %89 = vector.broadcast %11 : f32 to vector<1x256xf32>
    %90 = arith.mulf %89, %88 : vector<1x256xf32>
    %91 = arith.addf %85, %90 : vector<1x256xf32>
    %92 = tpu.concatenate %41, %66, %91 in 0 : vector<1x256xf32>, vector<1x256xf32>, vector<1x256xf32> -> vector<3x256xf32>
    %93 = arith.index_cast %16 : i32 to index
    %c0_48 = arith.constant 0 : index
    %c0_49 = arith.constant 0 : index
    %94 = vector.load %arg5[%93, %c0_48, %c0_49] : memref<1x3x256xf32, #tpu.memory_space<vmem>>, vector<1x3x256xf32>
    %95 = vector.shape_cast %94 : vector<1x3x256xf32> to vector<3x256xf32>
    %96 = vector.shape_cast %92 : vector<3x256xf32> to vector<1x3x256xf32>
    tpu.vector_store %arg5[%93, %c0_48, %c0_49], %96 {strides = array<i32>} : memref<1x3x256xf32, #tpu.memory_space<vmem>>, vector<1x3x256xf32>,
    %c1_i32_50 = arith.constant 1 : i32
    return
  }
  func.func @transform_0(%arg0: i32, %arg1: i32) -> (i32, i32, i32) {
    %c0_i32 = arith.constant 0 : i32
    %c0_i32_0 = arith.constant 0 : i32
    return %arg0, %c0_i32, %arg1 : i32, i32, i32
  }
  func.func @transform_1(%arg0: i32, %arg1: i32) -> (i32, i32) {
    %c0_i32 = arith.constant 0 : i32
    %c0_i32_0 = arith.constant 0 : i32
    %c0_i32_1 = arith.constant 0 : i32
    return %c0_i32, %c0_i32_0 : i32, i32
  }
  func.func @transform_2(%arg0: i32, %arg1: i32) -> i32 {
    %c0_i32 = arith.constant 0 : i32
    %c0_i32_0 = arith.constant 0 : i32
    return %c0_i32 : i32
  }
  func.func @transform_3(%arg0: i32, %arg1: i32) -> (i32, i32, i32) {
    %c0_i32 = arith.constant 0 : i32
    %c0_i32_0 = arith.constant 0 : i32
    return %arg0, %c0_i32, %arg1 : i32, i32, i32
  }
}

</mosaic_0001>

<bundles_post_ra>
// kernel: outconv_forward.1
= control target key start
LH: loop header
LB: loop body
LE: loop exit
PB: predicated region body
PF: predicated region fallthrough
CT: control target
= control target key end

     0   :  { %8 = vsyncpa [#allocation3], 0  ;;  %s683_s0 = inlined_call_operand.vmem [shape: f32[2,4,256], index: 0, kind: input, shape index: {}]   ;;  %s684_s1 = inlined_call_operand.vmem [shape: f32[3,4], index: 1, kind: input, shape index: {}]   ;;  %s685_s2 = inlined_call_operand.vmem [shape: f32[3], index: 2, kind: input, shape index: {}]   ;;  %s686_s3 = inlined_call_operand.vmem [shape: f32[2,3,256], index: 3, kind: output, shape index: {}]  }
   0x1   :  { %9 = vsyncpa [#allocation5], 0  ;;  %s597_s12 = smov 0   ;;  %s599_s13 = smov 0  }
   0x2   :  { %s601_s14 = smov 0  }
   0x3 LB: > { %s435_s15 = sadd.s32 4294967295, %s573_s14   ;;  %s27_s16 = sadd.s32 1, %s569_s13  ;;  %s573_s14 = sphi %s601_s14, %s15_s14   ;;  %s569_s13 = sphi %s599_s13, %s689_s13   ;;  %s565_s12 = sphi %s597_s12, %s688_s12  }
   0x4   : > { %p29_p0 = scmp.ge.s32.totalorder %s27_s16, 2  ;;  %p437_p1 = scmp.ge.s32.totalorder %s573_s14, 1 }
   0x5   : > { %p130_p2 = scmp.lt.s32.totalorder %s573_s14, 3  ;;  %p618_p4 = scmp.eq.s32.totalorder %s435_s15, 0 }
   0x6   : > { %s691_s16 = smov (%p29_p0, %s27_s16), 0  ;;  %s142_s20 = sshll.u32 %s684_s1, 4  ;;  %s143_s20 = int_to_ptr.vmem [resolvable:$true] %s142_s20 }
   0x7   : > { %p131_p3 = pnand %p437_p1, %p130_p2  ;;  %s152_s23 = sshll.u32 %s685_s2, 4  ;;  %s153_s23 = int_to_ptr.vmem [resolvable:$true] %s152_s23 }
   0x8   : > { %s575_s24 = smov [#allocation2]   ;;  %s576_s25 = smov [#allocation4]  }
   0x9   : > { %p476_p5 = pneg %p131_p3 }
   0xa   : > { %178 = sbr.rel (%p131_p3) target bundleno = 56 (0x38), region = 32 }
   0xb   : > { %p477_p6 = pnand %p618_p4, %p476_p5 }
   0xd   : > { %479 = dma.vmem_to_smem (!%p477_p6), %s143_s20, 64, %s575_s24, [#allocation3]  }
   0xe   : > { %482 = dma.vmem_to_smem (!%p477_p6), %s153_s23, 16, %s576_s25, [#allocation5]  }
   0xf   : > { %556 = dma.done.wait (%p618_p4), [#allocation3], 64  }
  0x10   : > { %558 = vsyncadd (%p618_p4), [#allocation3], 4294967232 }
  0x11   : > { %560 = dma.done.wait (%p618_p4), [#allocation5], 16  }
  0x12   : > { %562 = vsyncadd (%p618_p4), [#allocation5], 4294967280 }
  0x13   : > { %190 = sfence }
  0x14   : > { %p218_p7 = scmp.lt.s32.totalorder %s565_s12, 1  ;;  %s237_s26 = sld [smem:[#allocation2]]  ;;  %vm313_vm0 = vcmask 1040384   ;;  %vm316_vm1 = vcmask 1041408   ;;  %vm322_vm2 = vcmask 1043456  }
  0x15   : > { %s448_s27 = sld [smem:[#allocation2 + $0x1]] }
  0x16   : > { %s693_s12 = smov (!%p218_p7, %s565_s12), 1  ;;  %s449_s28 = sld [smem:[#allocation2 + $0x2]] }
  0x17   : > { %s642_s29 = sld [smem:[#allocation2 + $0x3]]  ;;  %s466_s5 = sshll.u32 %s693_s12, 3 }
  0x18   : > { %s451_s30 = sld [smem:[#allocation2 + $0x80]]  ;;  %s225_s11 = scalar_lea.vmem %s683_s0, %s466_s5 }
  0x19   : > { %s644_s4 = sld [smem:[#allocation2 + $0x81]]  ;;  %v252_v0 = vld [vmem:[%s225_s11] ss:$4 sm:$0x3]  ;;  %s235_s24 = scalar_lea.vmem %s686_s3, %s466_s5 }
  0x1a   : > { %s647_s6 = sld [smem:[#allocation2 + $0x82]]  ;;  %v253_v1 = vstv %s237_s26  ;;  %v461_v2 = vld [vmem:[%s225_s11 + $0x1] ss:$4 sm:$0x3] }
  0x1b   : > { %s649_s7 = sld [smem:[#allocation2 + $0x83]]  ;;  %v259_v4 = vstv %s448_s27  ;;  %v462_v5 = vld [vmem:[%s225_s11 + $0x2] ss:$4 sm:$0x3]  ;;  %v254_v8 = vmul.f32 %v253_v1, %v252_v0 }
  0x1c   : > { %s455_s8 = sld [smem:[#allocation2 + $0x100]]  ;;  %v264_v6 = vstv %s449_s28  ;;  %v260_v12 = vmul.f32 %v461_v2, %v259_v4  ;;  %v463_v17 = vld [vmem:[%s225_s11 + $0x3] ss:$4 sm:$0x3] }
  0x1d   : > { %s656_s15 = sld [smem:[#allocation2 + $0x101]]  ;;  %v265_v13 = vmul.f32 %v462_v5, %v264_v6  ;;  %v269_v18 = vstv %s642_s29 }
  0x1e   : > { %s658_s17 = sld [smem:[#allocation2 + $0x102]]  ;;  %v272_v3 = vstv %s451_s30  ;;  %v270_v30 = vmul.f32 %v463_v17, %v269_v18 }
  0x1f   : > { %s660_s18 = sld [smem:[#allocation2 + $0x103]]  ;;  %v276_v9 = vstv %s644_s4  ;;  %v273_v10 = vmul.f32 %v272_v3, %v252_v0 }
  0x20   : > { %s249_s19 = sld [smem:[#allocation4]]  ;;  %v279_v14 = vstv %s647_s6  ;;  %v277_v19 = vmul.f32 %v461_v2, %v276_v9 }
  0x21   : > { %s459_s20 = sld [smem:[#allocation4 + $0x1]]  ;;  %v282_v23 = vstv %s649_s7  ;;  %v280_v26 = vmul.f32 %v462_v5, %v279_v14 }
  0x22   : > { %s460_s21 = sld [smem:[#allocation4 + $0x2]]  ;;  %v285_v7 = vstv %s455_s8  ;;  %v283_v34 = vmul.f32 %v463_v17, %v282_v23 }
  0x23   : > { %v289_v11 = vstv %s656_s15  ;;  %v286_v15 = vmul.f32 %v285_v7, %v252_v0 }
  0x24   : > { %v292_v20 = vstv %s658_s17  ;;  %v290_v24 = vmul.f32 %v461_v2, %v289_v11 }
  0x25   : > { %v295_v28 = vstv %s660_s18  ;;  %v293_v32 = vmul.f32 %v462_v5, %v292_v20 }
  0x26   : > { %v255_v16 = vstv %s249_s19  ;;  %v296_v37 = vmul.f32 %v463_v17, %v295_v28 }
  0x27   : > { %v256_v21 = vadd.f32 %v255_v16, %v254_v8  ;;  %v274_v22 = vstv %s459_s20 }
  0x28   : > { %v275_v25 = vadd.f32 %v274_v22, %v273_v10  ;;  %v287_v27 = vstv %s460_s21 }
  0x29   : > { %v261_v29 = vadd.f32 %v260_v12, %v256_v21  ;;  %v288_v31 = vadd.f32 %v287_v27, %v286_v15 }
  0x2a   : > { %v278_v33 = vadd.f32 %v277_v19, %v275_v25 }
  0x2b   : > { %v266_v35 = vadd.f32 %v265_v13, %v261_v29  ;;  %v291_v36 = vadd.f32 %v290_v24, %v288_v31 }
  0x2c   : > { %v281_v38 = vadd.f32 %v280_v26, %v278_v33 }
  0x2d   : > { %v271_v39 = vadd.f32 %v270_v30, %v266_v35  ;;  %v294_v40 = vadd.f32 %v293_v32, %v291_v36 }
  0x2e   : > { %v284_v41 = vadd.f32 %v283_v34, %v281_v38 }
  0x2f   : > { %v297_v42 = vadd.f32 %v296_v37, %v294_v40  ;;  %v299_v43 = vperm.slane %v271_v39, 0  ;;  %v300_v44 = vperm.slane %v271_v39, 1 }
  0x30   : > { %v304_v45 = vperm.slane %v284_v41, 0  ;;  %v305_v46 = vperm.slane %v284_v41, 1 }
  0x31   : > { %v309_v47 = vperm.slane %v297_v42, 0  ;;  %v310_v48 = vperm.slane %v297_v42, 1 }
  0x32   : > { %v314_v49 = vsel %vm313_vm0, %v299_v43, %v304_v45  ;;  %v315_v50 = vsel %vm313_vm0, %v300_v44, %v305_v46 }
  0x33   : > { %v317_v51 = vsel %vm316_vm1, %v314_v49, %v309_v47  ;;  %v318_v52 = vsel %vm316_vm1, %v315_v50, %v310_v48 }
  0x34   : > { %v321_v53 = vrot.slane %v318_v52, 4 }
  0x36   : > { %v323_v54 = vsel %vm322_vm2, %v317_v51, %v321_v53 }
  0x37   : > { %325 = vst [vmem:[%s235_s24] sm:$0x77] %v323_v54 }
  0x38 PF: > { %s15_s14 = sadd.s32 1, %s573_s14   ;;  %s688_s12 = smov %s569_s13 }
  0x39   : > { %p12_p8 = scmp.ge.s32.totalorder %s15_s14, 4   ;;  %s689_s13 = smov %s691_s16 }
  0x3b   :  { %14 = sbr.rel (!%p12_p8) target bundleno = 3 (0x3), region = 74 }
  0x40   :  { %356 = vsyncpa [#allocation3], 1 }
  0x41   :  { %358 = vsyncpa [#allocation3 + $0x1], 1 }
  0x42   :  { %359 = vsyncpa [#allocation5], 1 }

</bundles_post_ra>
